<compile_context>
chip_gen: v7x
topology: tpu7x:2x2x1
jax: 0.10.0
libtpu: 0.0.40
codegen_flags: <defaults>
</compile_context>

<pallas_src>
import numpy as np
import jax
import jax.numpy as jnp
from jax import lax
from jax.experimental import pallas as pl
from jax.experimental.pallas import tpu as pltpu

_HIGHEST = lax.Precision.HIGHEST


# ----------------------------------------------------------------------------
# Transfer-matrix construction (host-side, deterministic; faithful port of
# Profile._make_transfer).
# ----------------------------------------------------------------------------
def mg2k(m, g, M):
    """Convert from (m, g) indexing to k indexing."""
    return m + M * g


def make_transfer(M):
    K = 2 * M + 1
    r_transf_0 = np.zeros((M, 3, 2, K), np.float32)
    u_transf_0 = np.zeros((M, 3, 2, K), np.float32)
    null_transf_0 = np.zeros((K,), np.float32)

    m, g = -1, 0
    for gp in range(2):
        for mp in range(M + gp):
            kp = mg2k(mp, gp, M)
            if m + 1 - g == mp and gp == 0:
                r_transf_0[m + 1 - g, g, 0, kp] = 1
                u_transf_0[m + 1 - g, g, 0, kp] = 1
            elif m + 1 - g < mp and gp == 0:
                r_transf_0[m + 1 - g, g, 0, kp] = 1
                u_transf_0[m + 1 - g, g, 1, kp] = 1
                for mpp in range(m + 2 - g, mp):
                    r_transf_0[mpp, 2, 0, kp] = 1
                    u_transf_0[mpp, 2, 1, kp] = 1
                r_transf_0[mp, 2, 0, kp] = 1
                u_transf_0[mp, 2, 0, kp] = 1
            elif m + 1 - g == mp and gp == 1:
                if mp < M:
                    r_transf_0[m + 1 - g, g, 1, kp] = 1
            elif m + 1 - g < mp and gp == 1:
                r_transf_0[m + 1 - g, g, 0, kp] = 1
                u_transf_0[m + 1 - g, g, 1, kp] = 1
                for mpp in range(m + 2 - g, mp):
                    r_transf_0[mpp, 2, 0, kp] = 1
                    u_transf_0[mpp, 2, 1, kp] = 1
                if mp < M:
                    r_transf_0[mp, 2, 1, kp] = 1
            else:
                null_transf_0[kp] = 1

    r_transf = np.zeros((M, 3, 2, K, K), np.float32)
    u_transf = np.zeros((M, 3, 2, K, K), np.float32)
    null_transf = np.zeros((K, K), np.float32)
    for g in range(2):
        for m in range(M + g):
            for gp in range(2):
                for mp in range(M + gp):
                    k, kp = mg2k(m, g, M), mg2k(mp, gp, M)
                    if m + 1 - g == mp and gp == 0:
                        r_transf[m + 1 - g, g, 0, k, kp] = 1
                        u_transf[m + 1 - g, g, 0, k, kp] = 1
                    elif m + 1 - g < mp and gp == 0:
                        r_transf[m + 1 - g, g, 0, k, kp] = 1
                        u_transf[m + 1 - g, g, 1, k, kp] = 1
                        r_transf[m + 2 - g:mp, 2, 0, k, kp] = 1
                        u_transf[m + 2 - g:mp, 2, 1, k, kp] = 1
                        r_transf[mp, 2, 0, k, kp] = 1
                        u_transf[mp, 2, 0, k, kp] = 1
                    elif m + 1 - g == mp and gp == 1:
                        if mp < M:
                            r_transf[m + 1 - g, g, 1, k, kp] = 1
                    elif m + 1 - g < mp and gp == 1:
                        r_transf[m + 1 - g, g, 0, k, kp] = 1
                        u_transf[m + 1 - g, g, 1, k, kp] = 1
                        r_transf[m + 2 - g:mp, 2, 0, k, kp] = 1
                        u_transf[m + 2 - g:mp, 2, 1, k, kp] = 1
                        if mp < M:
                            r_transf[mp, 2, 1, k, kp] = 1
                    else:
                        null_transf[k, kp] = 1

    # (vx_transf / vc_transf are unused in forward, so not built here.)
    return r_transf_0, u_transf_0, null_transf_0, r_transf, u_transf, null_transf


# ----------------------------------------------------------------------------
# Helpers
# ----------------------------------------------------------------------------
def _round_up(x, m):
    return ((x + m - 1) // m) * m


def _pad2(a, rows, cols):
    out = np.zeros((rows, cols), a.dtype)
    out[:a.shape[0], :a.shape[1]] = a
    return out


def _vmem_capacity_bytes():
    """Physical VMEM per core; conservative 64 MiB fallback (v7x-safe)."""
    try:
        info = pltpu.get_tpu_info()
        cap = getattr(info, "vmem_capacity_bytes", None)
        if cap:
            return int(cap)
    except Exception:
        pass
    return 64 << 20


# ----------------------------------------------------------------------------
# Kernels
# ----------------------------------------------------------------------------
def _transition_kernel(hi_ref, lo_ref, w_ref, b_ref, out_ref):
    # int8 0/1 weights -> bf16 (exact); two bf16 MXU passes (hi + lo halves of
    # the f32 lhs) with f32 accumulation; separate f32 bias add.
    w = w_ref[...].astype(jnp.bfloat16)
    acc = jnp.dot(hi_ref[...], w, preferred_element_type=jnp.float32)
    acc = acc + jnp.dot(lo_ref[...], w, preferred_element_type=jnp.float32)
    out_ref[...] = acc + b_ref[...]


def _init_kernel(hi_ref, lo_ref, w0_ref, b0_ref, init_ref):
    w = w0_ref[...].astype(jnp.bfloat16)
    init_ref[...] = (
        jnp.dot(hi_ref[...], w, preferred_element_type=jnp.float32)
        + jnp.dot(lo_ref[...], w, preferred_element_type=jnp.float32)
        + b0_ref[...])


def _init_obs_kernel(hi_ref, lo_ref, w0_ref, b0_ref, prec_ref, insq_ref,
                     sub_ref, init_ref, obsp_ref, obsi_ref):
    _init_kernel(hi_ref, lo_ref, w0_ref, b0_ref, init_ref)

    @pl.when(pl.program_id(0) == 0)
    def _():
        # Observation logits: out[n, a] = logsumexp_d(seq[n, d] + sub[d, a]).
        # D and A are tiny, so stay on the VPU (no MXU latency).
        sub = sub_ref[...]                                 # (D, Ap)
        c2 = jnp.max(sub, axis=0, keepdims=True)           # (1, Ap)
        c2 = jnp.where(c2 > -jnp.inf, c2, 0.0)
        sub_s = sub - c2

        def lse(seq):                                      # (R, D) -> (R, Ap)
            dd = seq.shape[1]
            c1 = jnp.max(seq, axis=1, keepdims=True)       # (R, 1)
            c1 = jnp.where(c1 > -jnp.inf, c1, 0.0)
            shifted = seq - c1                             # (R, D)
            s = jnp.exp(shifted[:, 0:1] + sub_s[0:1, :])   # (R, Ap)
            for i in range(1, dd):                         # static unroll
                s = s + jnp.exp(shifted[:, i:i + 1] + sub_s[i:i + 1, :])
            return c1 + c2 + jnp.log(s)

        obsp_ref[...] = lse(prec_ref[...])
        obsi_ref[...] = lse(insq_ref[...])


# ----------------------------------------------------------------------------
# Wrapper (Profile.forward equivalent)
# ----------------------------------------------------------------------------
class ProfilePallas:
    def __init__(self, M, epsilon=1e-32):
        self.M = int(M)
        self.K = 2 * self.M + 1
        self.epsilon = float(epsilon)
        M, K = self.M, self.K
        MK = M * 3 * 2
        KK = K * K
        self.MK = MK
        self.MKW = 2 * MK                       # fused [u; r] contraction dim
        self.MKWp = _round_up(self.MKW, 32)     # int8 sublane-pack friendly
        self.Kp = _round_up(K, 128)
        self.KKp = _round_up(KK, 128)

        # Generation-aware VMEM cap: never exceed physical (v7x = 64 MiB).
        phys = _vmem_capacity_bytes()
        self.vmem_limit = int(max(32 << 20, min(phys - (8 << 20), 100 << 20)))

        r0, u0, n0, r, u, n = make_transfer(M)
        neg_inv_eps = np.float32(-1.0 / self.epsilon)

        # Fused weight stacks: rows = [u (delete); r (insert)].
        w0 = np.concatenate([u0.reshape(MK, K), r0.reshape(MK, K)], axis=0)
        w = np.concatenate([u.reshape(MK, KK), r.reshape(MK, KK)], axis=0)

        # 0/1 transfer matrices stored as int8 (lossless; 4x less HBM vs f32).
        self.w0_p = jnp.asarray(_pad2(w0.astype(np.int8), self.MKWp, self.Kp))
        self.w_p = jnp.asarray(_pad2(w.astype(np.int8), self.MKWp, self.KKp))
        # Pre-scaled (-1/eps) * null biases kept in f32 (exactness of -1e32).
        self.bias0_p = jnp.asarray(
            _pad2((neg_inv_eps * n0).reshape(1, K), 1, self.Kp))
        self.bias_p = jnp.asarray(
            _pad2((neg_inv_eps * n).reshape(1, KK), 1, self.KKp))

    # Lane tile + vmem request, sized from the *actual* batch B at call time.
    def _tile_and_vmem(self, B, total_cols, extra_fixed=0):
        rows = self.MKWp
        fixed = 2 * (2 * B * rows * 2) + extra_fixed + (6 << 20)
        per_col = 4 * rows + 16 * B + 64   # int8 dbuf + bf16 copy + out dbuf
        avail = self.vmem_limit - fixed
        if avail >= per_col * 128:
            tn = (avail // per_col) // 128 * 128
        else:
            tn = 128
        tn = int(max(128, min(tn, _round_up(total_cols, 128))))
        est = fixed + per_col * tn + (8 << 20)
        vmem = int(min(self.vmem_limit, max(32 << 20, est)))
        return tn, vmem

    def __call__(self, precursor_seq_logits, insert_seq_logits,
                 insert_logits, delete_logits, substitute_logits=None):
        f32 = jnp.float32
        M, K, MK = self.M, self.K, self.MK
        MKW, MKWp, Kp, KKp = self.MKW, self.MKWp, self.Kp, self.KKp

        batch_shape = delete_logits.shape[:-3]
        delete_flat = delete_logits.astype(f32).reshape((-1, MK))
        insert_flat = insert_logits.astype(f32).reshape((-1, MK))
        B = delete_flat.shape[0]

        # Fused lhs for the stacked [u; r] weights, padded to MKWp.
        lhs = jnp.concatenate([delete_flat, insert_flat], axis=-1)
        if MKWp > MKW:
            lhs = jnp.pad(lhs, ((0, 0), (0, MKWp - MKW)))
        # f32 -> (hi, lo) bf16 split: exact bf16 weights + f32 accumulation
        # recover ~f32 accuracy with plain bf16 MXU passes (no f32 weight
        # upcast in VMEM, no HIGHEST multi-pass emulation).
        lhs_hi = lhs.astype(jnp.bfloat16)
        lhs_lo = (lhs - lhs_hi.astype(f32)).astype(jnp.bfloat16)

        # torch-style broadcasting of the sequence logits.
        if precursor_seq_logits.ndim > insert_seq_logits.ndim:
            insert_seq_logits = jnp.broadcast_to(
                insert_seq_logits[None],
                (precursor_seq_logits.shape[0],) + insert_seq_logits.shape)
        elif insert_seq_logits.ndim > precursor_seq_logits.ndim:
            precursor_seq_logits = jnp.broadcast_to(
                precursor_seq_logits[None],
                (insert_seq_logits.shape[0],) + precursor_seq_logits.shape)

        lane = lambda j: (0, j)
        const = lambda j: (0, 0)

        # ---- Kernel A: transition logits (dominant O(M^3) stream). --------
        # All outputs are lane-tiled => grid axis is "parallel" (megacore /
        # v7x dual-TC safe), each core streams its own share of the weights.
        TN, vmem_a = self._tile_and_vmem(B, KKp)
        grid_a = (pl.cdiv(KKp, TN),)
        trans_p = pl.pallas_call(
            _transition_kernel,
            grid=grid_a,
            in_specs=[pl.BlockSpec((B, MKWp), const),
                      pl.BlockSpec((B, MKWp), const),
                      pl.BlockSpec((MKWp, TN), lane),
                      pl.BlockSpec((1, TN), lane)],
            out_specs=pl.BlockSpec((B, TN), lane),
            out_shape=jax.ShapeDtypeStruct((B, KKp), f32),
            compiler_params=pltpu.CompilerParams(
                dimension_semantics=("parallel",),
                vmem_limit_bytes=vmem_a),
        )(lhs_hi, lhs_lo, self.w_p, self.bias_p)

        # ---- Kernel B: initial logits (+ fused observation LSE). ----------
        use_fused_obs = (substitute_logits is not None
                         and substitute_logits.ndim == 2)
        if use_fused_obs:
            D = precursor_seq_logits.shape[-1]
            A = substitute_logits.shape[-1]
            Ap = _round_up(A, 128)
            sub_pad = jnp.pad(substitute_logits.astype(f32),
                              ((0, 0), (0, Ap - A)))
            prec2d = precursor_seq_logits.astype(f32).reshape((-1, D))
            insq2d = insert_seq_logits.astype(f32).reshape((-1, D))
            RP, RI = prec2d.shape[0], insq2d.shape[0]

            extra = (2 * 4 * (RP * D + RI * D + D * Ap)
                     + 5 * 4 * (RP + RI) * Ap)
            TN0, vmem_b = self._tile_and_vmem(B, Kp, extra_fixed=extra)
            grid_b = (pl.cdiv(Kp, TN0),)
            init_p, obsp, obsi = pl.pallas_call(
                _init_obs_kernel,
                grid=grid_b,
                in_specs=[pl.BlockSpec((B, MKWp), const),
                          pl.BlockSpec((B, MKWp), const),
                          pl.BlockSpec((MKWp, TN0), lane),
                          pl.BlockSpec((1, TN0), lane),
                          pl.BlockSpec((RP, D), const),
                          pl.BlockSpec((RI, D), const),
                          pl.BlockSpec((D, Ap), const)],
                out_specs=(pl.BlockSpec((B, TN0), lane),
                           pl.BlockSpec((RP, Ap), const),
                           pl.BlockSpec((RI, Ap), const)),
                out_shape=(jax.ShapeDtypeStruct((B, Kp), f32),
                           jax.ShapeDtypeStruct((RP, Ap), f32),
                           jax.ShapeDtypeStruct((RI, Ap), f32)),
                compiler_params=pltpu.CompilerParams(
                    dimension_semantics=("arbitrary",),
                    vmem_limit_bytes=vmem_b),
            )(lhs_hi, lhs_lo, self.w0_p, self.bias0_p, prec2d, insq2d, sub_pad)

            obs_prec = obsp[:, :A].reshape(
                precursor_seq_logits.shape[:-1] + (A,))
            obs_ins = obsi[:, :A].reshape(
                insert_seq_logits.shape[:-1] + (A,))
            observation_logits = jnp.concatenate([obs_prec, obs_ins], axis=-2)
        else:
            TN0, vmem_b = self._tile_and_vmem(B, Kp)
            grid_b = (pl.cdiv(Kp, TN0),)
            init_p = pl.pallas_call(
                _init_kernel,
                grid=grid_b,
                in_specs=[pl.BlockSpec((B, MKWp), const),
                          pl.BlockSpec((B, MKWp), const),
                          pl.BlockSpec((MKWp, TN0), lane),
                          pl.BlockSpec((1, TN0), lane)],
                out_specs=pl.BlockSpec((B, TN0), lane),
                out_shape=jax.ShapeDtypeStruct((B, Kp), f32),
                compiler_params=pltpu.CompilerParams(
                    dimension_semantics=("arbitrary",),
                    vmem_limit_bytes=vmem_b),
            )(lhs_hi, lhs_lo, self.w0_p, self.bias0_p)

            seq_logits = jnp.concatenate(
                [precursor_seq_logits, insert_seq_logits], axis=-2)
            if substitute_logits is None:
                observation_logits = seq_logits
            else:
                # TODO(synk): batched substitute_logits (ndim > 2) handled with
                # plain XLA logsumexp rather than the fused kernel.
                observation_logits = jax.nn.logsumexp(
                    seq_logits[..., :, :, None]
                    + substitute_logits[..., None, :, :], axis=-2)

        initial_logits = init_p[:, :K].reshape(batch_shape + (K,))
        transition_logits = trans_p[:, :K * K].reshape(batch_shape + (K, K))
        return initial_logits, transition_logits, observation_logits


# ----------------------------------------------------------------------------
# Pure-JAX reference (for correctness check)
# ----------------------------------------------------------------------------
def reference_forward(prof, prec, ins_seq, ins, dele, sub):
    M, K = prof.M, prof.K
    r0, u0, n0, r, u, n = make_transfer(M)
    u0, r0, n0 = jnp.asarray(u0), jnp.asarray(r0), jnp.asarray(n0)
    u, r, n = jnp.asarray(u), jnp.asarray(r), jnp.asarray(n)
    neg = -1.0 / prof.epsilon
    init = (jnp.einsum('bijk,ijkl->bl', dele, u0, precision=_HIGHEST)
            + jnp.einsum('bijk,ijkl->bl', ins, r0, precision=_HIGHEST)
            + neg * n0)
    trans = (jnp.einsum('bijk,ijklf->blf', dele, u, precision=_HIGHEST)
             + jnp.einsum('bijk,ijklf->blf', ins, r, precision=_HIGHEST)
             + neg * n)
    seq = jnp.concatenate([prec, ins_seq], axis=-2)
    obs = jax.nn.logsumexp(seq[..., :, :, None] + sub[None, :, :], axis=-2)
    return init, trans, obs


# ----------------------------------------------------------------------------
# Main
# ----------------------------------------------------------------------------
if __name__ == "__main__":
    B, M, D, A = 2, 8, 5, 4   # batch, profile length, latent alphabet, data alphabet
    prof = ProfilePallas(M)

    key = jax.random.PRNGKey(0)
    k1, k2, k3, k4, k5 = jax.random.split(key, 5)
    precursor_seq_logits = jax.nn.log_softmax(
        jax.random.normal(k1, (B, M, D), jnp.float32), axis=-1)
    insert_seq_logits = jax.nn.log_softmax(
        jax.random.normal(k2, (B, M + 1, D), jnp.float32), axis=-1)
    insert_logits = jax.nn.log_softmax(
        jax.random.normal(k3, (B, M, 3, 2), jnp.float32), axis=-1)
    delete_logits = jax.nn.log_softmax(
        jax.random.normal(k4, (B, M, 3, 2), jnp.float32), axis=-1)
    substitute_logits = jax.nn.log_softmax(
        jax.random.normal(k5, (D, A), jnp.float32), axis=-1)

    init, trans, obs = prof(precursor_seq_logits, insert_seq_logits,
                            insert_logits, delete_logits, substitute_logits)
    jax.block_until_ready((init, trans, obs))

    # correctness check against pure-JAX reference
    ref_init, ref_trans, ref_obs = reference_forward(
        prof, precursor_seq_logits, insert_seq_logits,
        insert_logits, delete_logits, substitute_logits)
    np.testing.assert_allclose(np.asarray(init), np.asarray(ref_init),
                               rtol=1e-5, atol=1e-3)
    np.testing.assert_allclose(np.asarray(trans), np.asarray(ref_trans),
                               rtol=1e-5, atol=1e-3)
    np.testing.assert_allclose(np.asarray(obs), np.asarray(ref_obs),
                               rtol=1e-5, atol=1e-4)

    # substitute_logits=None path (params-only kernels, obs is a pass-through)
    init2, trans2, obs2 = prof(precursor_seq_logits, insert_seq_logits,
                               insert_logits, delete_logits, None)
    jax.block_until_ready((init2, trans2, obs2))
    np.testing.assert_allclose(np.asarray(init2), np.asarray(ref_init),
                               rtol=1e-5, atol=1e-3)
    np.testing.assert_allclose(np.asarray(trans2), np.asarray(ref_trans),
                               rtol=1e-5, atol=1e-3)
    np.testing.assert_allclose(
        np.asarray(obs2),
        np.asarray(jnp.concatenate([precursor_seq_logits, insert_seq_logits],
                                   axis=-2)),
        rtol=0, atol=0)

    print("KERNEL_OK")
</pallas_src>

<mosaic_0001>
module attributes {stable_mosaic.version = 11 : i64} {
  func.func @_transition_kernel(%arg0: i32, %arg1: memref<2x96xbf16, #tpu.memory_space<vmem>>, %arg2: memref<2x96xbf16, #tpu.memory_space<vmem>>, %arg3: memref<96x384xi8, #tpu.memory_space<vmem>>, %arg4: memref<1x384xf32, #tpu.memory_space<vmem>>, %arg5: memref<2x384xf32, #tpu.memory_space<vmem>>) attributes {dimension_semantics = [#tpu.dimension_semantics<parallel>], iteration_bounds = array<i64: 1>, scalar_prefetch = 0 : i64, scratch_operands = 0 : i64, tpu.core_type = #tpu.core_type<tc>, window_params = [{pipeline_mode = #tpu.pipeline_mode<synchronous>, transform_indices = @transform_0, window_bounds = array<i64: 2, 96>}, {pipeline_mode = #tpu.pipeline_mode<synchronous>, transform_indices = @transform_1, window_bounds = array<i64: 2, 96>}, {transform_indices = @transform_2, window_bounds = array<i64: 96, 384>}, {transform_indices = @transform_3, window_bounds = array<i64: 1, 384>}, {transform_indices = @transform_4, window_bounds = array<i64: 2, 384>}]} {
    %c0 = arith.constant 0 : index
    %c0_0 = arith.constant 0 : index
    %0 = vector.load %arg3[%c0, %c0_0] : memref<96x384xi8, #tpu.memory_space<vmem>>, vector<96x384xi8>
    %1 = arith.sitofp %0 : vector<96x384xi8> to vector<96x384xbf16>
    %c0_1 = arith.constant 0 : index
    %c0_2 = arith.constant 0 : index
    %2 = vector.load %arg1[%c0_1, %c0_2] : memref<2x96xbf16, #tpu.memory_space<vmem>>, vector<2x96xbf16>
    %cst = arith.constant dense<0.000000e+00> : vector<2x384xf32>
    %3 = tpu.matmul %2, %1, %cst {dimension_numbers = #tpu.dot_dimension_numbers<[1], [0], [0], [1], [0, 0, 1, 1], [], []>} : vector<2x96xbf16>, vector<96x384xbf16>, vector<2x384xf32> -> vector<2x384xf32>
    %c0_3 = arith.constant 0 : index
    %c0_4 = arith.constant 0 : index
    %4 = vector.load %arg2[%c0_3, %c0_4] : memref<2x96xbf16, #tpu.memory_space<vmem>>, vector<2x96xbf16>
    %cst_5 = arith.constant dense<0.000000e+00> : vector<2x384xf32>
    %5 = tpu.matmul %4, %1, %cst_5 {dimension_numbers = #tpu.dot_dimension_numbers<[1], [0], [0], [1], [0, 0, 1, 1], [], []>} : vector<2x96xbf16>, vector<96x384xbf16>, vector<2x384xf32> -> vector<2x384xf32>
    %6 = arith.addf %3, %5 : vector<2x384xf32>
    %c0_6 = arith.constant 0 : index
    %c0_7 = arith.constant 0 : index
    %7 = vector.load %arg4[%c0_6, %c0_7] : memref<1x384xf32, #tpu.memory_space<vmem>>, vector<1x384xf32>
    %8 = vector.broadcast %7 : vector<1x384xf32> to vector<2x384xf32>
    %9 = arith.addf %6, %8 : vector<2x384xf32>
    %c0_8 = arith.constant 0 : index
    %c0_9 = arith.constant 0 : index
    %10 = vector.load %arg5[%c0_8, %c0_9] : memref<2x384xf32, #tpu.memory_space<vmem>>, vector<2x384xf32>
    tpu.vector_store %arg5[%c0_8, %c0_9], %9 {strides = array<i32>} : memref<2x384xf32, #tpu.memory_space<vmem>>, vector<2x384xf32>,
    return
  }
  func.func @transform_0(%arg0: i32) -> (i32, i32) {
    %c0_i32 = arith.constant 0 : i32
    %c0_i32_0 = arith.constant 0 : i32
    %c0_i32_1 = arith.constant 0 : i32
    return %c0_i32, %c0_i32_0 : i32, i32
  }
  func.func @transform_1(%arg0: i32) -> (i32, i32) {
    %c0_i32 = arith.constant 0 : i32
    %c0_i32_0 = arith.constant 0 : i32
    %c0_i32_1 = arith.constant 0 : i32
    return %c0_i32, %c0_i32_0 : i32, i32
  }
  func.func @transform_2(%arg0: i32) -> (i32, i32) {
    %c0_i32 = arith.constant 0 : i32
    %c0_i32_0 = arith.constant 0 : i32
    return %c0_i32, %arg0 : i32, i32
  }
  func.func @transform_3(%arg0: i32) -> (i32, i32) {
    %c0_i32 = arith.constant 0 : i32
    %c0_i32_0 = arith.constant 0 : i32
    return %c0_i32, %arg0 : i32, i32
  }
  func.func @transform_4(%arg0: i32) -> (i32, i32) {
    %c0_i32 = arith.constant 0 : i32
    %c0_i32_0 = arith.constant 0 : i32
    return %c0_i32, %arg0 : i32, i32
  }
}

</mosaic_0001>

<bundles_post_ra>
// kernel: tpu_custom_call.1
= control target key start
LH: loop header
LB: loop body
LE: loop exit
PB: predicated region body
PF: predicated region fallthrough
CT: control target
= control target key end

     0   :  { %9 = vsyncpa [#allocation3], 0  ;;  %s536_s0 = inlined_call_operand.hbm [shape: bf16[2,96], index: 0, kind: input, shape index: {}]   ;;  %s537_s1 = inlined_call_operand.vmem [shape: bf16[2,96], index: 1, kind: input, shape index: {}]   ;;  %s538_s2 = inlined_call_operand.hbm [shape: s8[96,384], index: 2, kind: input, shape index: {}]   ;;  %s539_s3 = inlined_call_operand.vmem [shape: f32[1,384], index: 3, kind: input, shape index: {}]   ;;  %s540_s4 = inlined_call_operand.hbm [shape: f32[2,384], index: 4, kind: output, shape index: {}]  }
   0x1   :  { %10 = vsyncpa [#allocation6], 0 }
   0x2   :  { %11 = vsyncpa [#allocation4], 0  ;;  %s431_s15 = smov [#allocation2]   ;;  %s432_s17 = smov [#allocation5]  }
   0x3   :  { %s18_s16 = sshll.u32 %s431_s15, 4  ;;  %s29_s18 = sshll.u32 %s432_s17, 4  ;;  %s19_s16 = int_to_ptr.vmem [resolvable:$true] %s18_s16  ;;  %s465_s18 = int_to_ptr.vmem [resolvable:$true] %s29_s18 }
   0x4   :  { %s359_s21 = scalar_lea.hbm %s536_s0, 16 }
   0x5   :  { %p360_p0 = scmp.ne.s32.totalorder %s536_s0, %s359_s21  ;;  %p363_p1 = scmp.lt.u32.totalorder %s359_s21, %s536_s0 }
   0x7   :  { %p365_p2 = pnand %p363_p1, %p360_p0 }
   0x9   :  { %368 = shalt.err (!%p365_p2)
}
   0xa   :  { %s369_s26 = scalar_lea.vmem %s19_s16, 16  ;;  %s373_s27 = scalar_lea.vmem %s19_s16, 32 }
   0xb   :  { %p370_p3 = scmp.ne.s32.totalorder %s19_s16, %s369_s26  ;;  %p374_p4 = scmp.lt.s32.totalorder %s19_s16, %s19_s16 }
   0xc   :  { %p375_p5 = scmp.lt.s32.totalorder %s373_s27, %s369_s26 }
   0xe   :  { %p376_p6 = por %p375_p5, %p374_p4 }
  0x10   :  { %p377_p7 = pnand %p376_p6, %p370_p3 }
  0x12   :  { %380 = shalt.err (!%p377_p7)
}
  0x13   :  { %21 = dma.hbm_to_vmem [thread:$0]  %s536_s0, 16, %s19_s16, [#allocation3]  }
  0x14   :  { %s381_s6 = scalar_lea.hbm %s538_s2, 1152 }
  0x15   :  { %p382_p8 = scmp.ne.s32.totalorder %s538_s2, %s381_s6  ;;  %p385_p9 = scmp.lt.u32.totalorder %s381_s6, %s538_s2 }
  0x17   :  { %p387_p10 = pnand %p385_p9, %p382_p8 }
  0x19   :  { %390 = shalt.err (!%p387_p10)
}
  0x1a   :  { %s391_s11 = scalar_lea.vmem %s465_s18, 1152  ;;  %p396_p12 = scmp.lt.s32.totalorder %s465_s18, %s465_s18 }
  0x1b   :  { %p392_p11 = scmp.ne.s32.totalorder %s465_s18, %s391_s11  ;;  %p397_p13 = scmp.lt.s32.totalorder %s391_s11, %s391_s11 }
  0x1d   :  { %p398_p0 = por %p397_p13, %p396_p12 }
  0x1f   :  { %p399_p1 = pnand %p398_p0, %p392_p11 }
  0x21   :  { %402 = shalt.err (!%p399_p1)
}
  0x22   :  { %s433_s0 = smov 384   ;;  %s434_s12 = smov 24  }
  0x23   :  { %35 = dma.hbm_to_vmem [thread:$0]  %s538_s2, 1152, %s465_s18, [#allocation6], %s433_s0, %s433_s0, %s434_s12  }
  0x24   :  { %425 = dma.done.wait [#allocation3], 16  }
  0x25   :  { %426 = vsyncadd [#allocation3], 4294967280 }
  0x26   :  { %427 = dma.done.wait [#allocation6], 1152  }
  0x27   :  { %428 = vsyncadd [#allocation6], 4294966144  ;;  %v435_v0 = vmov 0.0   ;;  %v436_v1 = vmov 0   ;;  %vm437_vm0 = vmmov 0   ;;  %v46_v2 = vld [vmem:[#allocation5 + $0x8] sm:$0xff]  ;;  %v245_v39 = vlaneseq }
  0x28   :  { %318 = vmatprep.subr.bf16.mxu1 %v435_v0  ;;  %110 = vmatprep.mubr.bf16.mxu0 %v436_v1  ;;  %v47_v3 = vld [vmem:[#allocation5 + $0x10] sm:$0xff]  ;;  %v45_v4 = vld [vmem:[#allocation5] sm:$0xff]  ;;  %v55_v5 = vunpack.c.l.s8.bf16 %v46_v2  ;;  %v58_v6 = vunpack.c.h.s8.bf16 %v46_v2  ;;  %v50_v12 = vld [vmem:[#allocation5 + $0x28] sm:$0xff]  ;;  %vm74_vm1 = vcmask 785408   ;;  %v438_v44 = vmov 1983009808  }
  0x29   :  { %330 = vmatprep.mubr.msk.bf16.mxu1 %vm437_vm0, %v435_v0  ;;  %v56_v7 = vunpack.c.l.s8.bf16 %v47_v3  ;;  %v54_v8 = vunpack.c.l.s8.bf16 %v45_v4  ;;  %v49_v9 = vld [vmem:[#allocation5 + $0x20] sm:$0xff]  ;;  %v59_v10 = vunpack.c.h.s8.bf16 %v47_v3  ;;  %v57_v11 = vunpack.c.h.s8.bf16 %v45_v4  ;;  %v48_v14 = vld [vmem:[#allocation5 + $0x18] sm:$0xff]  ;;  %v51_v23 = vld [vmem:[#allocation5 + $0x30] sm:$0xff] }
  0x2a   :  { %78 = vmatprep.subr.bf16.mxu0 %v55_v5  ;;  %v61_v13 = vunpack.c.l.s8.bf16 %v49_v9  ;;  %v62_v15 = vunpack.c.l.s8.bf16 %v50_v12  ;;  %v60_v16 = vunpack.c.l.s8.bf16 %v48_v14  ;;  %v64_v17 = vunpack.c.h.s8.bf16 %v49_v9  ;;  %v52_v18 = vld [vmem:[#allocation5 + $0x38] sm:$0xff]  ;;  %v53_v21 = vld [vmem:[#allocation5 + $0x40] sm:$0xff]  ;;  %v73_v29 = vld [vmem:[%s537_s1] sm:$0x1] }
  0x2b   :  { %319 = vmatpush3.bf16.msra.mxu1 %v56_v7  ;;  %79 = vmatpush1.bf16.msra.mxu0 %v54_v8  ;;  %v65_v19 = vunpack.c.h.s8.bf16 %v50_v12  ;;  %v63_v20 = vunpack.c.h.s8.bf16 %v48_v14  ;;  %v67_v22 = vunpack.c.l.s8.bf16 %v52_v18  ;;  %v68_v24 = vunpack.c.l.s8.bf16 %v53_v21  ;;  %v72_v30 = vld [vmem:[#allocation2] sm:$0x1]  ;;  %v243_v42 = vld [vmem:[%s539_s3] sm:$0x7]  ;;  %s439_s3 = smov [#allocation7]  }
  0x2c   :  { %320 = vmatprep.subr.bf16.mxu1 %v435_v0  ;;  %80 = vmatprep.subr.bf16.mxu0 %v58_v6  ;;  %v66_v25 = vunpack.c.l.s8.bf16 %v51_v23  ;;  %v70_v26 = vunpack.c.h.s8.bf16 %v52_v18  ;;  %v71_v27 = vunpack.c.h.s8.bf16 %v53_v21  ;;  %v69_v28 = vunpack.c.h.s8.bf16 %v51_v23  ;;  %s290_s17 = sshll.u32 %s439_s3, 4  ;;  %s291_s17 = int_to_ptr.vmem [resolvable:$true] %s290_s17 }
  0x2d   :  { %v246_v40 = vshrl.u32 %v245_v39, 7  ;;  %v268_v45 = vunpack.c.l.s4 %v438_v44  ;;  %s403_s18 = scalar_lea.vmem %s291_s17, 96  ;;  %p408_p3 = scmp.lt.s32.totalorder %s291_s17, %s291_s17 }
  0x2e   :  { %p404_p2 = scmp.ne.s32.totalorder %s291_s17, %s403_s18  ;;  %p409_p4 = scmp.lt.s32.totalorder %s403_s18, %s403_s18 }
  0x2f   :  { %321 = vmatpush3.bf16.msra.mxu1 %v59_v10  ;;  %81 = vmatpush1.bf16.msra.mxu0 %v57_v11  ;;  %v247_v41 = vsub.s32 0, %v246_v40  ;;  %v255_v43 = vsub.s32 2, %v246_v40  ;;  %v251_v46 = vsub.s32 1, %v246_v40  ;;  %v269_v51 = vunpack.c.0.s8 %v268_v45 }
  0x30   :  { %322 = vmatprep.subr.bf16.mxu1 %v435_v0  ;;  %82 = vmatprep.subr.bf16.mxu0 %v61_v13  ;;  %p410_p5 = por %p409_p4, %p408_p3 }
  0x31   :  { %v248_v48 = vrot.slane %v243_v42, %v247_v41  ;;  %v256_v50 = vrot.slane %v243_v42, %v255_v43  ;;  %v252_v53 = vrot.slane %v243_v42, %v251_v46 }
  0x32   :  { %p411_p6 = pnand %p410_p5, %p404_p2 }
  0x33   :  { %323 = vmatpush3.bf16.msra.mxu1 %v62_v15  ;;  %83 = vmatpush1.bf16.msra.mxu0 %v60_v16 }
  0x34   :  { %324 = vmatprep.subr.bf16.mxu1 %v435_v0  ;;  %84 = vmatprep.subr.bf16.mxu0 %v64_v17 }
  0x37   :  { %325 = vmatpush3.bf16.msra.mxu1 %v65_v19  ;;  %85 = vmatpush1.bf16.msra.mxu0 %v63_v20 }
  0x38   :  { %326 = vmatprep.subr.bf16.mxu1 %v435_v0  ;;  %86 = vmatprep.subr.bf16.mxu0 %v67_v22 }
  0x3b   :  { %327 = vmatpush3.bf16.msra.mxu1 %v68_v24  ;;  %87 = vmatpush1.bf16.msra.mxu0 %v66_v25 }
  0x3c   :  { %328 = vmatprep.subr.bf16.mxu1 %v435_v0  ;;  %88 = vmatprep.subr.bf16.mxu0 %v70_v26 }
  0x3f   :  { %329 = vmatpush3.bf16.msra.mxu1 %v71_v27  ;;  %89 = vmatpush1.bf16.msra.mxu0 %v69_v28 }
  0x40   :  { %334 = vmatprep.subr.bf16.mxu1 %v435_v0  ;;  %162 = vmatprep.subr.bf16.mxu0 %v55_v5 }
  0x42   :  { %331 = vmatmul.mubr.msk.bf16.vlgmr.msra.gmra.mrb[0].mxu1 %vm74_vm1, %v73_v29  ;;  %300 = vmatmul.mubr.msk.bf16.vlgmr.msra.gmra.mrb[0].mxu0 %vm74_vm1, %v73_v29 }
  0x43   :  { %335 = vmatpush3.bf16.msra.mxu1 %v56_v7  ;;  %163 = vmatpush1.bf16.msra.mxu0 %v54_v8 }
  0x44   :  { %336 = vmatprep.subr.bf16.mxu1 %v435_v0  ;;  %164 = vmatprep.subr.bf16.mxu0 %v58_v6 }
  0x45   :  { %346 = vmatprep.mubr.msk.bf16.mxu1 %vm437_vm0, %v435_v0  ;;  %194 = vmatprep.mubr.bf16.mxu0 %v436_v1 }
  0x47   :  { %337 = vmatpush3.bf16.msra.mxu1 %v59_v10  ;;  %165 = vmatpush1.bf16.msra.mxu0 %v57_v11 }
  0x48   :  { %338 = vmatprep.subr.bf16.mxu1 %v435_v0  ;;  %166 = vmatprep.subr.bf16.mxu0 %v61_v13 }
  0x4b   :  { %339 = vmatpush3.bf16.msra.mxu1 %v62_v15  ;;  %167 = vmatpush1.bf16.msra.mxu0 %v60_v16 }
  0x4c   :  { %340 = vmatprep.subr.bf16.mxu1 %v435_v0  ;;  %168 = vmatprep.subr.bf16.mxu0 %v64_v17 }
  0x4f   :  { %341 = vmatpush3.bf16.msra.mxu1 %v65_v19  ;;  %169 = vmatpush1.bf16.msra.mxu0 %v63_v20 }
  0x50   :  { %342 = vmatprep.subr.bf16.mxu1 %v435_v0  ;;  %170 = vmatprep.subr.bf16.mxu0 %v67_v22 }
  0x53   :  { %343 = vmatpush3.bf16.msra.mxu1 %v68_v24  ;;  %171 = vmatpush1.bf16.msra.mxu0 %v66_v25 }
  0x54   :  { %344 = vmatprep.subr.bf16.mxu1 %v435_v0  ;;  %172 = vmatprep.subr.bf16.mxu0 %v70_v26  ;;  %v272_v0 = vsub.s32 %v269_v51, %v246_v40 }
  0x57   :  { %345 = vmatpush3.bf16.msra.mxu1 %v71_v27  ;;  %173 = vmatpush1.bf16.msra.mxu0 %v69_v28 }
  0x5a   :  { %347 = vmatmul.mubr.msk.bf16.vlgmr.msra.gmra.mrb[4].mxu1 %vm74_vm1, %v72_v30  ;;  %302 = vmatmul.mubr.msk.bf16.vlgmr.msra.gmra.mrb[4].mxu0 %vm74_vm1, %v72_v30 }
 0x115   :  { %v153_v31 = vpop.f32.mrb[0].mxu1  ;;  %v112_v32 = vpop.f32.mrb[0].mxu0 }
 0x116   :  { %v332_v33 = vpop.f32.mrb[1].mxu1  ;;  %v114_v34 = vpop.f32.mrb[1].mxu0 }
 0x117   :  { %v156_v35 = vpop.f32.mrb[2].mxu1  ;;  %v116_v36 = vpop.f32.mrb[2].mxu0 }
 0x118   :  { %v333_v37 = vpop.f32.mrb[3].mxu1  ;;  %v117_v38 = vpop.f32.mrb[3].mxu0 }
 0x12d   :  { %v237_v47 = vpop.f32.mrb[4].mxu1  ;;  %v196_v52 = vpop.f32.mrb[4].mxu0 }
 0x12e   :  { %v238_v49 = vadd.f32 %v237_v47, %v153_v31  ;;  %v348_v54 = vpop.f32.mrb[5].mxu1  ;;  %v197_v55 = vadd.f32 %v196_v52, %v112_v32  ;;  %v198_v56 = vpop.f32.mrb[5].mxu0 }
 0x12f   :  { %v240_v57 = vpop.f32.mrb[6].mxu1  ;;  %v199_v58 = vadd.f32 %v198_v56, %v114_v34  ;;  %v200_v59 = vpop.f32.mrb[6].mxu0 }
 0x130   :  { %v349_v60 = vpop.f32.mrb[7].mxu1  ;;  %v260_v61 = vadd.f32 %v248_v48, %v197_v55  ;;  %v201_v62 = vpop.f32.mrb[7].mxu0  ;;  %v262_v63 = vadd.f32 %v256_v50, %v238_v49 }
 0x131   :  { %v261_v1 = vadd.f32 %v252_v53, %v199_v58 }
 0x132   :  { %v280_v3 = vrot.slane %v262_v63, %v272_v0 }
 0x133   :  { %v266_v2 = vcombine.low %v260_v61, %v261_v1 }
 0x135   :  { %v273_v4 = vrot.slane %v266_v2, %v272_v0 }
 0x137   :  { %v281_v5 = vcombine.low %v273_v4, %v280_v3 }
 0x139   :  { %283 = vst [vmem:[#allocation7] sm:$0x3f] %v281_v5 }
 0x13a   :  { %414 = shalt.err (!%p411_p6)
}
 0x13b   :  { %s415_s21 = scalar_lea.hbm %s540_s4, 96 }
 0x13c   :  { %p416_p7 = scmp.ne.s32.totalorder %s540_s4, %s415_s21  ;;  %p419_p8 = scmp.lt.u32.totalorder %s415_s21, %s540_s4 }
 0x13e   :  { %p421_p9 = pnand %p419_p8, %p416_p7 }
 0x140   :  { %424 = shalt.err (!%p421_p9)
}
 0x141   :  { %293 = dma.vmem_to_hbm [thread:$0]  %s291_s17, 96, %s540_s4, [#allocation4]  }
 0x142   :  { %429 = dma.done.wait [#allocation4], 96  }
 0x143   :  { %430 = vsyncadd [#allocation4], 4294967200 }
 0x144   :  { %297 = vsyncpa [#allocation3], 1 }
 0x145   :  { %298 = vsyncpa [#allocation6], 1 }
 0x146   :  { %299 = vsyncpa [#allocation4], 1 }

</bundles_post_ra>
